<compile_context>
chip_gen: v5e
topology: v5e:2x2
jax: 0.10.0
libtpu: 0.0.40
codegen_flags: <defaults>
</compile_context>

<pallas_src>
import functools

import jax
import jax.numpy as jnp
from jax.experimental import pallas as pl
from jax.experimental.pallas import tpu as pltpu


def _cdiv(a, b):
    return (a + b - 1) // b


def _round_up(a, b):
    return _cdiv(a, b) * b


def _pointnet_loss_kernel(pred_ref, target_ref, *rest, feature_transform,
                          mat_diff_loss_scale, batch_size, steps_per_chunk):
    if feature_transform:
        trans_ref, out_ref = rest
    else:
        (out_ref,) = rest

    chunk = pl.program_id(0)
    step = pl.program_id(1)

    # Per-chunk scalar accumulator lives in the SMEM output block (resident across
    # the 'arbitrary' reduction axis).
    @pl.when(step == 0)
    def _init():
        out_ref[0, 0] = jnp.float32(0.0)

    pred = pred_ref[...].astype(jnp.float32)          # [TB, C]  (bf16 upcast in-kernel)
    target = target_ref[...]                          # [TB, 1]  int32 (-1 on padded rows)
    tb, num_classes = pred.shape
    inv_b = 1.0 / batch_size

    # ---- NLL (reduction='mean') partial:  -sum_i pred[i, target[i]] / B ----
    col_ids = jax.lax.broadcasted_iota(jnp.int32, (tb, num_classes), 1)
    gathered = jnp.where(col_ids == target, pred, 0.0)   # padded rows (target=-1) -> 0
    partial = -jnp.sum(gathered) * inv_b

    if feature_transform:
        t = trans_ref[...]                            # [TB, d, d] native dtype
        d = t.shape[-1]

        # Batched per-sample grams on the MXU: G_b = A_b @ A_b^T, f32 accumulation.
        gram = jnp.einsum('bij,bkj->bik', t, t,
                          preferred_element_type=jnp.float32)   # [TB, d, d] f32

        # Direct (G - I) form: robust when G ~= I (the regularizer's target).
        row = jax.lax.broadcasted_iota(jnp.int32, (d, d), 0)
        col = jax.lax.broadcasted_iota(jnp.int32, (d, d), 1)
        eye = (row == col).astype(jnp.float32)                  # tiny [d, d]
        diff = gram - eye[None, :, :]                           # [TB, d, d]

        fro_sq = jnp.sum(diff * diff, axis=2)                   # [TB, d]
        fro_sq = jnp.sum(fro_sq, axis=1, keepdims=True)         # [TB, 1]
        fro = jnp.sqrt(fro_sq)                                  # [TB, 1]

        # Mask padded batch rows (all-zero trans rows would contribute sqrt(d)).
        start = (chunk * steps_per_chunk + step) * tb
        global_rows = start + jax.lax.broadcasted_iota(jnp.int32, (tb, 1), 0)
        fro = jnp.where(global_rows < batch_size, fro, 0.0)

        partial = partial + (mat_diff_loss_scale * inv_b) * jnp.sum(fro)

    out_ref[0, 0] += partial


def pointnet_loss(pred, target, trans_feat, feature_transform,
                  mat_diff_loss_scale=0.001):
    feature_transform = bool(feature_transform)
    B, C = pred.shape
    d = int(trans_feat.shape[1]) if feature_transform else 0

    # Batch block sizing.
    if feature_transform:
        # Per-row working set: trans block + gram + diff in f32.  Budget ~4 MiB.
        bytes_per_row = d * d * (trans_feat.dtype.itemsize + 8)
        cap = max(8, (int((4 << 20) // max(bytes_per_row, 1)) // 8) * 8)
        cap = min(cap, 128)
    else:
        cap = 2048      # NLL-only path is tiny & memory-bound: large tiles.
    tb = max(8, min(cap, _round_up(B, 8)))

    total_steps = _cdiv(B, tb)

    # 2-way 'parallel' chunk split only pays off on multi-TensorCore parts (v7x).
    dev_kind = ""
    try:
        dev_kind = jax.devices()[0].device_kind.lower()
    except Exception:
        pass
    multi_tc = ("v7" in dev_kind) or ("7x" in dev_kind)
    num_chunks = 2 if (multi_tc and total_steps >= 2) else 1

    steps = _cdiv(total_steps, num_chunks)
    b_pad = num_chunks * steps * tb
    pad = b_pad - B

    # Native dtype is passed straight through (no f32 upcast before the DMA).
    target_i = target.astype(jnp.int32).reshape(B, 1)
    if pad:
        pred_in = jnp.pad(pred, ((0, pad), (0, 0)))
        target_in = jnp.pad(target_i, ((0, pad), (0, 0)), constant_values=-1)
    else:
        pred_in, target_in = pred, target_i

    in_specs = [
        pl.BlockSpec((tb, C), lambda c, i: (c * steps + i, 0)),
        pl.BlockSpec((tb, 1), lambda c, i: (c * steps + i, 0)),
    ]
    args = [pred_in, target_in]

    if feature_transform:
        trans_in = trans_feat
        if pad:
            trans_in = jnp.pad(trans_in, ((0, pad), (0, 0), (0, 0)))
        in_specs.append(pl.BlockSpec((tb, d, d), lambda c, i: (c * steps + i, 0, 0)))
        args.append(trans_in)

    out_specs = pl.BlockSpec((1, 1), lambda c, i: (c, 0),
                             memory_space=pltpu.MemorySpace.SMEM)

    # VMEM budget from the actual block bytes (+ f32 gram/diff working set),
    # clamped to 48 MiB so it is legal on v7x (64 MiB physical VMEM).
    block_bytes = tb * C * pred_in.dtype.itemsize + tb * 4
    work_bytes = 0
    if feature_transform:
        block_bytes += tb * d * d * args[-1].dtype.itemsize
        work_bytes = 3 * tb * d * d * 4
    vmem_limit = int(min(48 << 20,
                         max(16 << 20, 4 * block_bytes + 2 * work_bytes + (1 << 20))))

    flops = 3 * b_pad * C
    transcendentals = 0
    bytes_accessed = (pred_in.size * pred_in.dtype.itemsize
                      + target_in.size * 4 + num_chunks * 4)
    if feature_transform:
        flops += 2 * b_pad * d * d * d + 4 * b_pad * d * d
        transcendentals = b_pad
        bytes_accessed += args[-1].size * args[-1].dtype.itemsize

    kernel = functools.partial(
        _pointnet_loss_kernel,
        feature_transform=feature_transform,
        mat_diff_loss_scale=float(mat_diff_loss_scale),
        batch_size=B,
        steps_per_chunk=steps,
    )

    partials = pl.pallas_call(
        kernel,
        out_shape=jax.ShapeDtypeStruct((num_chunks, 1), jnp.float32),
        grid_spec=pltpu.PrefetchScalarGridSpec(
            num_scalar_prefetch=0,
            grid=(num_chunks, steps),
            in_specs=in_specs,
            out_specs=out_specs,
        ),
        compiler_params=pltpu.CompilerParams(
            dimension_semantics=("parallel", "arbitrary"),
            vmem_limit_bytes=vmem_limit,
        ),
        cost_estimate=pl.CostEstimate(
            flops=int(flops),
            transcendentals=int(transcendentals),
            bytes_accessed=int(bytes_accessed),
        ),
    )(*args)

    # Combine the per-chunk partial sums (2 chunks only on multi-TC parts).
    return jnp.sum(partials)


def _reference_loss(pred, target, trans_feat, feature_transform,
                    mat_diff_loss_scale=0.001):
    # Pure-JAX reference mirroring the PyTorch module.
    pred = pred.astype(jnp.float32)
    nll = -jnp.mean(pred[jnp.arange(pred.shape[0]), target])
    loss = nll
    if feature_transform:
        t = trans_feat.astype(jnp.float32)
        d = t.shape[1]
        eye = jnp.eye(d, dtype=jnp.float32)
        gram = jnp.einsum('bij,bkj->bik', t, t)
        norms = jnp.sqrt(jnp.sum((gram - eye[None]) ** 2, axis=(1, 2)))
        loss = loss + jnp.mean(norms) * mat_diff_loss_scale
    return loss


if __name__ == "__main__":
    key = jax.random.PRNGKey(0)
    k1, k2, k3 = jax.random.split(key, 3)

    B, C, D = 8, 16, 16   # batch, num classes, feature-transform dim

    logits = jax.random.normal(k1, (B, C), dtype=jnp.float32)
    pred = jax.nn.log_softmax(logits, axis=-1)       # log-probs, like F.nll_loss expects
    target = jax.random.randint(k2, (B,), 0, C, dtype=jnp.int32)
    trans_feat = jax.random.normal(k3, (B, D, D), dtype=jnp.float32) * 0.1

    ok = True

    # f32, with and without the feature-transform regularizer
    for ft in (True, False):
        got = pointnet_loss(pred, target, trans_feat, feature_transform=ft)
        jax.block_until_ready(got)
        want = _reference_loss(pred, target, trans_feat, feature_transform=ft)
        if not jnp.allclose(got, want, rtol=1e-5, atol=1e-5):
            ok = False

    # Batch not a multiple of the block (exercises padding + in-kernel masking).
    Bo = 5
    got = pointnet_loss(pred[:Bo], target[:Bo], trans_feat[:Bo], feature_transform=True)
    jax.block_until_ready(got)
    want = _reference_loss(pred[:Bo], target[:Bo], trans_feat[:Bo], feature_transform=True)
    if not jnp.allclose(got, want, rtol=1e-5, atol=1e-5):
        ok = False

    # bf16 inputs accepted directly (no wrapper f32 casts; f32 accumulation inside).
    got = pointnet_loss(pred.astype(jnp.bfloat16), target,
                        trans_feat.astype(jnp.bfloat16), feature_transform=True)
    jax.block_until_ready(got)
    want = _reference_loss(pred.astype(jnp.bfloat16), target,
                           trans_feat.astype(jnp.bfloat16), feature_transform=True)
    if not jnp.allclose(got, want, rtol=5e-2, atol=5e-2):
        ok = False

    if ok:
        print("KERNEL_OK")
</pallas_src>

<mosaic_0001>
module attributes {stable_mosaic.version = 11 : i64} {
  func.func @_pointnet_loss_kernel(%arg0: i32, %arg1: i32, %arg2: memref<8x16xf32, #tpu.memory_space<vmem>>, %arg3: memref<8x1xi32, #tpu.memory_space<vmem>>, %arg4: memref<8x16x16xf32, #tpu.memory_space<vmem>>, %arg5: memref<1x1xf32, #tpu.memory_space<smem>>) attributes {dimension_semantics = [#tpu.dimension_semantics<parallel>, #tpu.dimension_semantics<arbitrary>], iteration_bounds = array<i64: 1, 1>, scalar_prefetch = 0 : i64, scratch_operands = 0 : i64, tpu.core_type = #tpu.core_type<tc>, window_params = [{transform_indices = @transform_0, window_bounds = array<i64: 8, 16>}, {transform_indices = @transform_1, window_bounds = array<i64: 8, 1>}, {transform_indices = @transform_2, window_bounds = array<i64: 8, 16, 16>}, {transform_indices = @transform_3, window_bounds = array<i64: 1, 1>}]} {
    %c0_i32 = arith.constant 0 : i32
    %0 = arith.cmpi eq, %arg1, %c0_i32 : i32
    %1 = arith.extui %0 : i1 to i32
    %c0_i32_0 = arith.constant 0 : i32
    %2 = arith.cmpi ne, %1, %c0_i32_0 : i32
    scf.if %2 {
      %cst_21 = arith.constant 0.000000e+00 : f32
      %c0_22 = arith.constant 0 : index
      %c0_23 = arith.constant 0 : index
      %50 = memref.load %arg5[%c0_22, %c0_23] : memref<1x1xf32, #tpu.memory_space<smem>>
      memref.store %cst_21, %arg5[%c0_22, %c0_23] : memref<1x1xf32, #tpu.memory_space<smem>>
    } else {
    }
    %c0 = arith.constant 0 : index
    %c0_1 = arith.constant 0 : index
    %3 = vector.load %arg2[%c0, %c0_1] : memref<8x16xf32, #tpu.memory_space<vmem>>, vector<8x16xf32>
    %c0_2 = arith.constant 0 : index
    %c0_3 = arith.constant 0 : index
    %4 = vector.load %arg3[%c0_2, %c0_3] : memref<8x1xi32, #tpu.memory_space<vmem>>, vector<8x1xi32>
    %5 = tpu.iota {dimensions = array<i32: 1>} : vector<8x16xi32>
    %6 = vector.broadcast %4 : vector<8x1xi32> to vector<8x16xi32>
    %7 = arith.cmpi eq, %5, %6 : vector<8x16xi32>
    %cst = arith.constant 0.000000e+00 : f32
    %8 = vector.broadcast %cst : f32 to vector<8x16xf32>
    %9 = arith.select %7, %3, %8 : vector<8x16xi1>, vector<8x16xf32>
    %10 = vector.shape_cast %9 : vector<8x16xf32> to vector<1x8x16xf32>
    %cst_4 = arith.constant dense<0.000000e+00> : vector<1xf32>
    %11 = vector.multi_reduction <add>, %10, %cst_4 [1, 2] : vector<1x8x16xf32> to vector<1xf32>
    %12 = vector.shape_cast %11 : vector<1xf32> to vector<1x1x1xf32>
    %13 = vector.extract %12[0, 0, 0] : f32 from vector<1x1x1xf32>
    %cst_5 = arith.constant 0.000000e+00 : f32
    %14 = arith.subf %cst_5, %13 : f32
    %cst_6 = arith.constant 1.250000e-01 : f32
    %15 = arith.mulf %14, %cst_6 : f32
    %c0_7 = arith.constant 0 : index
    %c0_8 = arith.constant 0 : index
    %c0_9 = arith.constant 0 : index
    %16 = vector.load %arg4[%c0_7, %c0_8, %c0_9] : memref<8x16x16xf32, #tpu.memory_space<vmem>>, vector<8x16x16xf32>
    "tpu.trace_start"() <{level = 10 : i32, message = "bij,bkj->bik"}> : () -> ()
    %cst_10 = arith.constant dense<0.000000e+00> : vector<8x16x16xf32>
    %17 = tpu.matmul %16, %16, %cst_10 {dimension_numbers = #tpu.dot_dimension_numbers<[2], [2], [1], [1], [0, 0, 0, 1, 1, 1], [0], [0]>} : vector<8x16x16xf32>, vector<8x16x16xf32>, vector<8x16x16xf32> -> vector<8x16x16xf32>
    "tpu.trace_stop"() : () -> ()
    %18 = tpu.iota {dimensions = array<i32: 0>} : vector<16x16xi32>
    %19 = tpu.iota {dimensions = array<i32: 1>} : vector<16x16xi32>
    %20 = arith.cmpi eq, %18, %19 : vector<16x16xi32>
    %21 = arith.extui %20 : vector<16x16xi1> to vector<16x16xi32>
    %22 = arith.sitofp %21 : vector<16x16xi32> to vector<16x16xf32>
    %23 = vector.shape_cast %22 : vector<16x16xf32> to vector<1x16x16xf32>
    %24 = vector.broadcast %23 : vector<1x16x16xf32> to vector<8x16x16xf32>
    %25 = arith.subf %17, %24 : vector<8x16x16xf32>
    %26 = arith.mulf %25, %25 : vector<8x16x16xf32>
    %cst_11 = arith.constant dense<0.000000e+00> : vector<8x16xf32>
    %27 = vector.multi_reduction <add>, %26, %cst_11 [2] : vector<8x16x16xf32> to vector<8x16xf32>
    %cst_12 = arith.constant dense<0.000000e+00> : vector<8xf32>
    %28 = vector.multi_reduction <add>, %27, %cst_12 [1] : vector<8x16xf32> to vector<8xf32>
    %29 = vector.shape_cast %28 : vector<8xf32> to vector<8x1xf32>
    %30 = math.sqrt %29 : vector<8x1xf32>
    %c1_i32 = arith.constant 1 : i32
    %31 = arith.muli %arg0, %c1_i32 : i32
    %32 = arith.addi %31, %arg1 : i32
    %c8_i32 = arith.constant 8 : i32
    %33 = arith.muli %32, %c8_i32 : i32
    %34 = tpu.iota {dimensions = array<i32: 0>} : vector<8x1xi32>
    %35 = vector.broadcast %33 : i32 to vector<8x1xi32>
    %36 = arith.addi %35, %34 : vector<8x1xi32>
    %c8_i32_13 = arith.constant 8 : i32
    %37 = vector.broadcast %c8_i32_13 : i32 to vector<8x1xi32>
    %38 = arith.cmpi slt, %36, %37 : vector<8x1xi32>
    %cst_14 = arith.constant 0.000000e+00 : f32
    %39 = vector.broadcast %cst_14 : f32 to vector<8x1xf32>
    %40 = arith.select %38, %30, %39 : vector<8x1xi1>, vector<8x1xf32>
    %41 = vector.shape_cast %40 : vector<8x1xf32> to vector<1x8x1xf32>
    %cst_15 = arith.constant dense<0.000000e+00> : vector<1xf32>
    %42 = vector.multi_reduction <add>, %41, %cst_15 [1, 2] : vector<1x8x1xf32> to vector<1xf32>
    %43 = vector.shape_cast %42 : vector<1xf32> to vector<1x1x1xf32>
    %44 = vector.extract %43[0, 0, 0] : f32 from vector<1x1x1xf32>
    %cst_16 = arith.constant 1.250000e-04 : f32
    %45 = arith.mulf %cst_16, %44 : f32
    %46 = arith.addf %15, %45 : f32
    %c0_17 = arith.constant 0 : index
    %c0_18 = arith.constant 0 : index
    %47 = memref.load %arg5[%c0_17, %c0_18] : memref<1x1xf32, #tpu.memory_space<smem>>
    %48 = arith.addf %47, %46 : f32
    %c0_19 = arith.constant 0 : index
    %c0_20 = arith.constant 0 : index
    %49 = memref.load %arg5[%c0_19, %c0_20] : memref<1x1xf32, #tpu.memory_space<smem>>
    memref.store %48, %arg5[%c0_19, %c0_20] : memref<1x1xf32, #tpu.memory_space<smem>>
    return
  }
  func.func @transform_0(%arg0: i32, %arg1: i32) -> (i32, i32) {
    %c1_i32 = arith.constant 1 : i32
    %0 = arith.muli %arg0, %c1_i32 : i32
    %1 = arith.addi %0, %arg1 : i32
    %c0_i32 = arith.constant 0 : i32
    %c0_i32_0 = arith.constant 0 : i32
    return %1, %c0_i32 : i32, i32
  }
  func.func @transform_1(%arg0: i32, %arg1: i32) -> (i32, i32) {
    %c1_i32 = arith.constant 1 : i32
    %0 = arith.muli %arg0, %c1_i32 : i32
    %1 = arith.addi %0, %arg1 : i32
    %c0_i32 = arith.constant 0 : i32
    %c0_i32_0 = arith.constant 0 : i32
    return %1, %c0_i32 : i32, i32
  }
  func.func @transform_2(%arg0: i32, %arg1: i32) -> (i32, i32, i32) {
    %c1_i32 = arith.constant 1 : i32
    %0 = arith.muli %arg0, %c1_i32 : i32
    %1 = arith.addi %0, %arg1 : i32
    %c0_i32 = arith.constant 0 : i32
    %c0_i32_0 = arith.constant 0 : i32
    %c0_i32_1 = arith.constant 0 : i32
    return %1, %c0_i32, %c0_i32_0 : i32, i32, i32
  }
  func.func @transform_3(%arg0: i32, %arg1: i32) -> (i32, i32) {
    %c0_i32 = arith.constant 0 : i32
    %c0_i32_0 = arith.constant 0 : i32
    return %arg0, %c0_i32 : i32, i32
  }
}

</mosaic_0001>

<bundles_post_ra>
// kernel: tpu_custom_call.1
= control target key start
LH: loop header
LB: loop body
LE: loop exit
PB: predicated region body
PF: predicated region fallthrough
CT: control target
= control target key end

     0   :  { %8 = vsyncpa [#allocation3], 0  ;;  %s769_s0 = inlined_call_operand.vmem [shape: f32[8,16], index: 0, kind: input, shape index: {}]   ;;  %s770_s1 = inlined_call_operand.vmem [shape: s32[8,1], index: 1, kind: input, shape index: {}]   ;;  %s771_s2 = inlined_call_operand.hbm [shape: f32[8,16,16], index: 2, kind: input, shape index: {}]   ;;  %s772_s3 = inlined_call_operand.hbm [shape: f32[1,1], index: 3, kind: output, shape index: {}]  }
   0x1   :  { %9 = vsyncpa [#allocation4], 0  ;;  %s35_s14 = sshll.u32 %s771_s2, 4  ;;  %s649_s15 = smov [#allocation2]   ;;  %s36_s14 = int_to_ptr.hbm [resolvable:$true] %s35_s14 }
   0x2   :  { %s37_s16 = sshll.u32 %s649_s15, 4  ;;  %s650_s17 = smov 128   ;;  %s38_s16 = int_to_ptr.vmem [resolvable:$true] %s37_s16 }
   0x3   :  { %s651_s18 = smov 8  }
   0x4   :  { %43 = dma.hbm_to_vmem [thread:$0]  %s36_s14, 2048, %s38_s16, [#allocation3], %s650_s17, %s650_s17, %s651_s18  }
   0x5   :  { %645 = dma.done.wait [#allocation3], 2048  }
   0x6   :  { %646 = vsyncadd [#allocation3], 4294965248  ;;  %vm87_vm0 = vcmask 130048   ;;  %v101_v0 = vld [vmem:[#allocation2 + $0x8] sm:$0xff]  ;;  %v103_v1 = vld [vmem:[#allocation2 + $0x18] sm:$0xff]  ;;  %v80_v16 = vlaneseq  ;;  %v652_v19 = vmov 0.0  }
   0x7   :  { %v105_v2 = vld [vmem:[#allocation2 + $0x28] sm:$0xff]  ;;  %560 = vmatpush.xpose.msk.msra.mxu0 %vm87_vm0, %v101_v0  ;;  %564 = vmatpush.xpose.msk.msra.mxu1 %vm87_vm0, %v103_v1  ;;  %v107_v3 = vld [vmem:[#allocation2 + $0x38] sm:$0xff]  ;;  %v100_v4 = vld [vmem:[#allocation2] sm:$0xff]  ;;  %vm456_vm3 = vcmask 130112   ;;  %vm479_vm4 = vcmask 1041409   ;;  %vm481_vm5 = vcmask 1042434  }
   0x8   :  { %568 = vmatpush.xpose.msk.msra.mxu2 %vm87_vm0, %v105_v2  ;;  %572 = vmatpush.xpose.msk.msra.mxu3 %vm87_vm0, %v107_v3  ;;  %v102_v5 = vld [vmem:[#allocation2 + $0x10] sm:$0xff]  ;;  %v104_v6 = vld [vmem:[#allocation2 + $0x20] sm:$0xff]  ;;  %v113_v8 = vld [vmem:[#allocation2 + $0x68] sm:$0xff]  ;;  %v710_v17 = vand.u32 127, %v80_v16  ;;  %v349_v18 = vshrl.u32 %v80_v16, 7  ;;  %vm483_vm6 = vcmask 1043459  }
   0x9   :  { %v106_v7 = vld [vmem:[#allocation2 + $0x30] sm:$0xff]  ;;  %v109_v9 = vld [vmem:[#allocation2 + $0x48] sm:$0xff]  ;;  %v111_v10 = vld [vmem:[#allocation2 + $0x58] sm:$0xff]  ;;  %vm485_vm7 = vcmask 1044484   ;;  %vm487_vm8 = vcmask 1045509   ;;  %vm489_vm9 = vcmask 1046534  }
   0xa   :  { %v115_v11 = vld [vmem:[#allocation2 + $0x78] sm:$0xff]  ;;  %v112_v12 = vld [vmem:[#allocation2 + $0x60] sm:$0xff]  ;;  %v110_v14 = vld [vmem:[#allocation2 + $0x50] sm:$0xff]  ;;  %vm351_vm1 = vcmp.eq.s32.totalorder %v349_v18, %v710_v17  ;;  %v350_v21 = vadd.s32 8, %v349_v18  ;;  %vm491_vm10 = vcmask 1047559   ;;  %vm515_vm13 = vcmask 7168  }
   0xb   :  { %561 = vmatpush.xpose.msk.msra.mxu0 %vm87_vm0, %v100_v4  ;;  %565 = vmatpush.xpose.msk.msra.mxu1 %vm87_vm0, %v102_v5  ;;  %v108_v13 = vld [vmem:[#allocation2 + $0x40] sm:$0xff]  ;;  %v114_v15 = vld [vmem:[#allocation2 + $0x70] sm:$0xff]  ;;  %v713_v20 = vsel %vm351_vm1, 1.0, %v652_v19  ;;  %s537_s27 = sshll.u32 %s772_s3, 4  ;;  %s654_s29 = smov [#allocation5]   ;;  %s538_s27 = int_to_ptr.hbm [resolvable:$true] %s537_s27 }
   0xc   :  { %569 = vmatpush.xpose.msk.msra.mxu2 %vm87_vm0, %v104_v6  ;;  %573 = vmatpush.xpose.msk.msra.mxu3 %vm87_vm0, %v106_v7  ;;  %vm352_vm2 = vcmp.eq.s32.totalorder %v350_v21, %v710_v17 }
   0xd   :  { %v593_v30 = vsel %vm352_vm2, 1.0, %v652_v19 }
   0xe   :  { %562 = vmatmul.msk.f32.vlgmr.msra.gmra.mxu0 %vm87_vm0, %v100_v4  ;;  %566 = vmatmul.msk.f32.vlgmr.msra.gmra.mxu1 %vm87_vm0, %v102_v5 }
   0xf   :  { %576 = vmatpush.xpose.msk.msrb.mxu0 %vm87_vm0, %v109_v9  ;;  %570 = vmatmul.msk.f32.vlgmr.msra.gmra.mxu2 %vm87_vm0, %v104_v6 }
  0x10   :  { %584 = vmatpush.xpose.msk.msrb.mxu2 %vm87_vm0, %v113_v8  ;;  %574 = vmatmul.msk.f32.vlgmr.msra.gmra.mxu3 %vm87_vm0, %v106_v7 }
  0x11   :  { %580 = vmatpush.xpose.msk.msrb.mxu1 %vm87_vm0, %v111_v10  ;;  %588 = vmatpush.xpose.msk.msrb.mxu3 %vm87_vm0, %v115_v11 }
  0x13   :  { %577 = vmatpush.xpose.msk.msrb.mxu0 %vm87_vm0, %v108_v13 }
  0x14   :  { %585 = vmatpush.xpose.msk.msrb.mxu2 %vm87_vm0, %v112_v12 }
  0x15   :  { %581 = vmatpush.xpose.msk.msrb.mxu1 %vm87_vm0, %v110_v14  ;;  %589 = vmatpush.xpose.msk.msrb.mxu3 %vm87_vm0, %v114_v15 }
  0x16   :  { %567 = vmatmul.msk.f32.gmra.mxu1 %vm87_vm0, %v103_v1  ;;  %563 = vmatmul.msk.f32.gmra.mxu0 %vm87_vm0, %v101_v0 }
  0x17   :  { %571 = vmatmul.msk.f32.gmra.mxu2 %vm87_vm0, %v105_v2 }
  0x18   :  { %575 = vmatmul.msk.f32.gmra.mxu3 %vm87_vm0, %v107_v3 }
  0x1e   :  { %578 = vmatmul.msk.f32.vlgmr.msrb.gmra.mxu0 %vm87_vm0, %v108_v13  ;;  %582 = vmatmul.msk.f32.vlgmr.msrb.gmra.mxu1 %vm87_vm0, %v110_v14 }
  0x1f   :  { %586 = vmatmul.msk.f32.vlgmr.msrb.gmra.mxu2 %vm87_vm0, %v112_v12 }
  0x20   :  { %590 = vmatmul.msk.f32.vlgmr.msrb.gmra.mxu3 %vm87_vm0, %v114_v15 }
  0x26   :  { %583 = vmatmul.msk.f32.gmra.mxu1 %vm87_vm0, %v111_v10  ;;  %579 = vmatmul.msk.f32.gmra.mxu0 %vm87_vm0, %v109_v9 }
  0x27   :  { %587 = vmatmul.msk.f32.gmra.mxu2 %vm87_vm0, %v113_v8 }
  0x28   :  { %591 = vmatmul.msk.f32.gmra.mxu3 %vm87_vm0, %v115_v11 }
  0x8b   :  { %v139_v22 = vpop.f32.mrf.mxu0  ;;  %v168_v23 = vpop.f32.mrf.mxu1 }
  0x8c   :  { %v357_v24 = vsub.f32 %v139_v22, %v713_v20  ;;  %v359_v25 = vsub.f32 %v168_v23, %v713_v20 }
  0x8e   :  { %v373_v26 = vmul.f32 %v357_v24, %v357_v24  ;;  %v375_v27 = vmul.f32 %v359_v25, %v359_v25 }
  0x90   :  { %v395_v28 = vsel %vm87_vm0, %v375_v27, 0.0  ;;  %v389_v29 = vsel %vm87_vm0, %v373_v26, 0.0 }
  0x91   :  { %396 = vadd.xlane.f32.xlu1 %v395_v28  ;;  %390 = vadd.xlane.f32.xlu0 %v389_v29 }
  0x92   :  { %v197_v31 = vpop.f32.mrf.mxu2 }
  0x93   :  { %v226_v32 = vpop.f32.mrf.mxu3  ;;  %v361_v33 = vsub.f32 %v197_v31, %v713_v20  ;;  %v171_v34 = vpop.f32.mrf.mxu1  ;;  %v653_v31 = vmov 0  }
  0x94   :  { %v363_v35 = vsub.f32 %v226_v32, %v713_v20  ;;  %v142_v36 = vpop.f32.mrf.mxu0  ;;  %v360_v37 = vsub.f32 %v171_v34, %v593_v30  ;;  %605 = vset.pattern.permute.xlu2 %v653_v31  ;;  %606 = vset.pattern.permute.xlu0 %v653_v31  ;;  %v454_v34 = vadd.s32 4294967288, %v710_v17 }
  0x95   :  { %v377_v38 = vmul.f32 %v361_v33, %v361_v33  ;;  %v358_v41 = vsub.f32 %v142_v36, %v593_v30 }
  0x96   :  { %v379_v39 = vmul.f32 %v363_v35, %v363_v35  ;;  %v376_v40 = vmul.f32 %v360_v37, %v360_v37 }
  0x97   :  { %v401_v42 = vsel %vm87_vm0, %v377_v38, 0.0  ;;  %v374_v46 = vmul.f32 %v358_v41, %v358_v41 }
  0x98   :  { %v407_v43 = vsel %vm87_vm0, %v379_v39, 0.0  ;;  %402 = vadd.xlane.f32.xlu2 %v401_v42  ;;  %v398_v44 = vsel %vm87_vm0, %v376_v40, 0.0 }
  0x99   :  { %399 = vadd.xlane.f32.xlu1 %v398_v44  ;;  %408 = vadd.xlane.f32.xlu0 %v407_v43  ;;  %v392_v56 = vsel %vm87_vm0, %v374_v46, 0.0 }
  0x9a   :  { %v200_v45 = vpop.f32.mrf.mxu2 }
  0x9b   :  { %v229_v47 = vpop.f32.mrf.mxu3  ;;  %v362_v48 = vsub.f32 %v200_v45, %v593_v30  ;;  %v284_v50 = vpop.f32.mrf.mxu1 }
  0x9c   :  { %v364_v49 = vsub.f32 %v229_v47, %v593_v30  ;;  %v255_v51 = vpop.f32.mrf.mxu0  ;;  %v367_v55 = vsub.f32 %v284_v50, %v713_v20 }
  0x9d   :  { %v378_v52 = vmul.f32 %v362_v48, %v362_v48  ;;  %v365_v54 = vsub.f32 %v255_v51, %v713_v20 }
  0x9e   :  { %v380_v53 = vmul.f32 %v364_v49, %v364_v49  ;;  %v383_v60 = vmul.f32 %v367_v55, %v367_v55 }
  0x9f   :  { %v404_v57 = vsel %vm87_vm0, %v378_v52, 0.0  ;;  %v381_v59 = vmul.f32 %v365_v54, %v365_v54 }
  0xa0   :  { %v410_v58 = vsel %vm87_vm0, %v380_v53, 0.0  ;;  %405 = vadd.xlane.f32.xlu2 %v404_v57  ;;  %v419_v5 = vsel %vm87_vm0, %v383_v60, 0.0 }
  0xa1   :  { %411 = vadd.xlane.f32.xlu1 %v410_v58  ;;  %393 = vadd.xlane.f32.xlu0 %v392_v56  ;;  %v413_v3 = vsel %vm87_vm0, %v381_v59, 0.0 }
  0xa2   :  { %v313_v61 = vpop.f32.mrf.mxu2 }
  0xa3   :  { %v342_v62 = vpop.f32.mrf.mxu3  ;;  %v369_v63 = vsub.f32 %v313_v61, %v713_v20  ;;  %v287_v0 = vpop.f32.mrf.mxu1 }
  0xa4   :  { %v258_v1 = vpop.f32.mrf.mxu0  ;;  %v368_v4 = vsub.f32 %v287_v0, %v593_v30  ;;  %v371_v18 = vsub.f32 %v342_v62, %v713_v20  ;;  %v79_v20 = vld [vmem:[%s770_s1] sm:$0xff] }
  0xa5   :  { %v385_v2 = vmul.f32 %v369_v63, %v369_v63  ;;  %v366_v6 = vsub.f32 %v258_v1, %v593_v30 }
  0xa6   :  { %v384_v8 = vmul.f32 %v368_v4, %v368_v4  ;;  %v387_v22 = vmul.f32 %v371_v18, %v371_v18 }
  0xa7   :  { %v425_v7 = vsel %vm87_vm0, %v385_v2, 0.0  ;;  %v382_v9 = vmul.f32 %v366_v6, %v366_v6 }
  0xa8   :  { %414 = vadd.xlane.f32.xlu2 %v413_v3  ;;  %v422_v14 = vsel %vm87_vm0, %v384_v8, 0.0  ;;  %v431_v24 = vsel %vm87_vm0, %v387_v22, 0.0 }
  0xa9   :  { %420 = vadd.xlane.f32.xlu1 %v419_v5  ;;  %426 = vadd.xlane.f32.xlu0 %v425_v7  ;;  %v416_v15 = vsel %vm87_vm0, %v382_v9, 0.0 }
  0xaa   :  { %v316_v10 = vpop.f32.mrf.mxu2 }
  0xab   :  { %v370_v11 = vsub.f32 %v316_v10, %v593_v30  ;;  %v345_v12 = vpop.f32.mrf.mxu3 }
  0xac   :  { %v372_v16 = vsub.f32 %v345_v12, %v593_v30  ;;  %v78_v12 = vld [vmem:[%s769_s0] sm:$0xff] }
  0xad   :  { %v386_v13 = vmul.f32 %v370_v11, %v370_v11 }
  0xae   :  { %v388_v21 = vmul.f32 %v372_v16, %v372_v16 }
  0xaf   :  { %v428_v19 = vsel %vm87_vm0, %v386_v13, 0.0 }
  0xb0   :  { %423 = vadd.xlane.f32.xlu2 %v422_v14  ;;  %v434_v23 = vsel %vm87_vm0, %v388_v21, 0.0 }
  0xb1   :  { %429 = vadd.xlane.f32.xlu1 %v428_v19  ;;  %417 = vadd.xlane.f32.xlu0 %v416_v15 }
  0xb8   :  { %432 = vadd.xlane.f32.xlu2 %v431_v24 }
  0xb9   :  { %435 = vadd.xlane.f32.xlu0 %v434_v23 }
  0xd0   :  { %83 = vperm.xlu2 %605, %v79_v20  }
 0x104   :  { %v397_v25 = vpop.xlane.xlu1 %396  ;;  %v391_v26 = vpop.xlane.xlu0 %390 }
 0x105   :  { %v458_v38 = vperm.slane %v397_v25, %v710_v17  ;;  %v453_v39 = vperm.slane %v391_v26, %v710_v17 }
 0x10b   :  { %v403_v27 = vpop.xlane.xlu2 %402 }
 0x10c   :  { %v400_v28 = vpop.xlane.xlu1 %399  ;;  %v409_v29 = vpop.xlane.xlu0 %408  ;;  %v461_v45 = vperm.slane %v403_v27, %v710_v17 }
 0x10d   :  { %v459_v40 = vperm.slane %v400_v28, %v454_v34  ;;  %v464_v51 = vperm.slane %v409_v29, %v710_v17 }
 0x10f   :  { %v460_v44 = vsel %vm456_vm3, %v459_v40, %v458_v38 }
 0x113   :  { %v406_v30 = vpop.xlane.xlu2 %405 }
 0x114   :  { %v412_v32 = vpop.xlane.xlu1 %411  ;;  %v394_v33 = vpop.xlane.xlu0 %393  ;;  %v462_v43 = vperm.slane %v406_v30, %v454_v34 }
 0x115   :  { %v455_v35 = vperm.slane %v394_v33, %v454_v34  ;;  %v465_v47 = vperm.slane %v412_v32, %v454_v34 }
 0x116   :  { %v463_v49 = vsel %vm456_vm3, %v462_v43, %v461_v45 }
 0x117   :  { %v457_v42 = vsel %vm456_vm3, %v455_v35, %v453_v39  ;;  %v466_v55 = vsel %vm456_vm3, %v465_v47, %v464_v51 }
 0x118   :  { %v480_v46 = vsel %vm479_vm4, %v460_v44, %v457_v42 }
 0x119   :  { %v482_v52 = vsel %vm481_vm5, %v463_v49, %v480_v46 }
 0x11a   :  { %v484_v59 = vsel %vm483_vm6, %v466_v55, %v482_v52 }
 0x11b   :  { %v415_v36 = vpop.xlane.xlu2 %414 }
 0x11c   :  { %v427_v37 = vpop.xlane.xlu0 %426  ;;  %v421_v41 = vpop.xlane.xlu1 %420  ;;  %v467_v53 = vperm.slane %v415_v36, %v710_v17 }
 0x11d   :  { %v470_v60 = vperm.slane %v421_v41, %v710_v17  ;;  %v473_v1 = vperm.slane %v427_v37, %v710_v17 }
 0x123   :  { %v424_v48 = vpop.xlane.xlu2 %423 }
 0x124   :  { %v418_v50 = vpop.xlane.xlu0 %417  ;;  %v471_v56 = vperm.slane %v424_v48, %v454_v34  ;;  %v430_v57 = vpop.xlane.xlu1 %429 }
 0x125   :  { %v468_v54 = vperm.slane %v418_v50, %v454_v34  ;;  %v474_v62 = vperm.slane %v430_v57, %v454_v34 }
 0x126   :  { %v472_v63 = vsel %vm456_vm3, %v471_v56, %v470_v60 }
 0x127   :  { %v469_v58 = vsel %vm456_vm3, %v468_v54, %v467_v53  ;;  %v475_v6 = vsel %vm456_vm3, %v474_v62, %v473_v1 }
 0x128   :  { %v486_v61 = vsel %vm485_vm7, %v469_v58, %v484_v59 }
 0x129   :  { %v488_v3 = vsel %vm487_vm8, %v472_v63, %v486_v61 }
 0x12a   :  { %v490_v8 = vsel %vm489_vm9, %v475_v6, %v488_v3 }
 0x12b   :  { %v433_v0 = vpop.xlane.xlu2 %432 }
 0x12c   :  { %v436_v2 = vpop.xlane.xlu0 %435  ;;  %v476_v4 = vperm.slane %v433_v0, %v710_v17 }
 0x12d   :  { %v477_v5 = vperm.slane %v436_v2, %v454_v34 }
 0x12f   :  { %v478_v7 = vsel %vm456_vm3, %v477_v5, %v476_v4 }
 0x130   :  { %v492_v9 = vsel %vm491_vm10, %v478_v7, %v490_v8 }
 0x131   :  { %v494_v10 = vsel %vm87_vm0, %v492_v9, 0.0 }
 0x132   :  { %495 = vadd.xlane.f32.xlu1 %v494_v10 }
 0x133   :  { %v84_v11 = vpop.permute.xlu2 %83 }
 0x134   :  { %vm85_vm11 = vcmp.eq.s32.totalorder %v710_v17, %v84_v11 }
 0x135   :  { %v86_v13 = vsel %vm85_vm11, %v78_v12, 0.0 }
 0x136   :  { %v88_v14 = vsel %vm87_vm0, %v86_v13, 0.0 }
 0x137   :  { %89 = vadd.xlane.f32.xlu0 %v88_v14 }
 0x1a5   :  { %v496_v15 = vpop.xlane.xlu1 %495 }
 0x1a6   :  { %607 = vrsqrt.f32 %v496_v15  ;;  %vm504_vm12 = vcmp.eq.f32.partialorder %v496_v15, inf  ;;  %v507_v25 = vand.u32 2147483648, %v496_v15  ;;  %vm506_vm14 = vcmp.eq.f32.partialorder %v496_v15, 0.0 }
 0x1aa   :  { %v90_v28 = vpop.xlane.xlu0 %89 }
 0x1ab   :  { %v91_v29 = vrot.slane %v90_v28, 4 }
 0x1ac   :  { %v608_v16 = vpop.eup %607 }
 0x1ad   :  { %v498_v18 = vmul.f32 %v608_v16, %v496_v15  ;;  %v92_v20 = vadd.f32 %v91_v29, %v90_v28 }
 0x1af   :  { %v499_v19 = vmul.f32 %v608_v16, %v498_v18  ;;  %v93_v30 = vrot.slane %v92_v20, 2 }
 0x1b1   :  { %v500_v21 = vmul.f32 0.5, %v499_v19  ;;  %v94_v31 = vadd.f32 %v93_v30, %v92_v20 }
 0x1b3   :  { %v501_v22 = vsub.f32 1.5, %v500_v21  ;;  %v95_v32 = vrot.slane %v94_v31, 1 }
 0x1b5   :  { %v502_v23 = vmul.f32 %v608_v16, %v501_v22  ;;  %v96_v33 = vadd.f32 %v95_v32, %v94_v31 }
 0x1b7   :  { %v503_v24 = vmul.f32 %v502_v23, %v496_v15  ;;  %594 = vpush %v96_v33 }
 0x1b9   :  { %v505_v26 = vsel %vm504_vm12, %v496_v15, %v503_v24 }
 0x1ba   :  { %v508_v27 = vsel %vm506_vm14, %v507_v25, %v505_v26 }
 0x1bb   :  { %v516_v17 = vsel %vm515_vm13, %v508_v27, 0.0 }
 0x1bc   :  { %517 = vadd.xlane.f32.xlu1 %v516_v17 }
 0x1e8   :  { %s595_s0 = spop %594 }
 0x1e9   :  { %s98_s21 = ssub.f32 0.0, %s595_s0 }
 0x1eb   :  { %s99_s22 = smul.f32 0.125, %s98_s21 }
 0x22f   :  { %v518_v34 = vpop.xlane.xlu1 %517 }
 0x230   :  { %v519_v35 = vrot.slane %v518_v34, 4 }
 0x232   :  { %v520_v36 = vadd.f32 %v519_v35, %v518_v34 }
 0x234   :  { %v521_v37 = vrot.slane %v520_v36, 2 }
 0x236   :  { %v522_v38 = vadd.f32 %v521_v37, %v520_v36 }
 0x238   :  { %v523_v39 = vrot.slane %v522_v38, 1 }
 0x23a   :  { %v524_v40 = vadd.f32 %v523_v39, %v522_v38 }
 0x23c   :  { %596 = vpush %v524_v40 }
 0x26d   :  { %s597_s23 = spop %596 }
 0x26e   :  { %s526_s24 = smul.f32 0.000125, %s597_s23 }
 0x270   :  { %s527_s28 = sadd.f32 %s526_s24, %s99_s22 }
 0x272   :  { %531 = sst [smem:[#allocation5]] %s527_s28 }
 0x273   :  { %540 = dma.smem_to_hbm %s654_s29, 16, %s538_s27, [#allocation4]  }
 0x274   :  { %647 = dma.done.wait [#allocation4], 16  }
 0x275   :  { %648 = vsyncadd [#allocation4], 4294967280 }
 0x276   :  { %545 = sfence }
 0x277   :  { %546 = vsyncpa [#allocation3], 1 }
 0x278   :  { %547 = vsyncpa [#allocation4], 1 }

</bundles_post_ra>
